<compile_context>
chip_gen: v6e
topology: v6e:2x2x1
jax: 0.10.0
libtpu: 0.0.40
codegen_flags: <defaults>
</compile_context>

<pallas_src>
import jax
import jax.numpy as jnp
from jax.experimental import pallas as pl
from jax.experimental.pallas import tpu as pltpu

LANE = 128                         # lane-dense last dim (one vreg width)
BLOCK_ROWS = 8192                  # (8192, 128) f32 tile = 4 MiB per buffer
VMEM_LIMIT_BYTES = 32 * 1024 * 1024


def _acos_f32(x):
    """Divide-free float32 acos (one EUP sqrt, ~22 VALU ops per element)."""
    c1 = jnp.float32(0.16666667)    # 1/6
    c2 = jnp.float32(0.075)         # 3/40
    c3 = jnp.float32(0.044642858)   # 15/336
    c4 = jnp.float32(0.03684594)    # 105/3456 + 0.006464 (economized z^5.. tail)
    pi = jnp.float32(3.14159265358979323846)
    pio2 = jnp.float32(1.57079632679489661923)
    one = jnp.float32(1.0)
    half = jnp.float32(0.5)

    absx = jnp.abs(x)
    small = absx < half
    # Shared polynomial / sqrt argument; z in [0, 0.25] for |x| <= 1.
    z = jnp.where(small, x * x, (one - absx) * half)

    # Q(z) = asin(t)/t with t = sqrt(z), t in [0, 0.5].  Horner, no divide.
    q = c4
    q = q * z + c3
    q = q * z + c2
    q = q * z + c1
    q = q * z + one

    s = jnp.sqrt(z)                 # single EUP op; NaN for |x| > 1
    t2 = (s + s) * q                # 2*asin(sqrt(z)) for the |x| >= 0.5 branch
    res_big = jnp.where(x < 0.0, pi - t2, t2)
    res_small = pio2 - x * q
    return jnp.where(small, res_small, res_big)


def _acos_kernel(x_ref, o_ref):
    # Compute in f32 regardless of I/O dtype (v5e has no bf16 VPU/EUP).
    x = x_ref[...].astype(jnp.float32)
    o_ref[...] = _acos_f32(x).astype(o_ref.dtype)


def acos_pallas(x, block_rows=BLOCK_ROWS):
    """Elementwise acos via a Pallas TPU kernel.  Works for any input shape."""
    orig_shape = x.shape
    dtype = x.dtype
    n = x.size
    if n == 0:
        return x

    xf = jnp.ravel(x)
    rem = n % LANE
    n_main = n - rem

    if n_main == 0:
        # Fewer than 128 elements: a kernel launch is not worth it.
        return jnp.arccos(xf).astype(dtype).reshape(orig_shape)

    main = xf if rem == 0 else xf[:n_main]
    rows = n_main // LANE
    x2 = main.reshape(rows, LANE)

    brows = min(block_rows, rows)
    if brows < rows:
        brows = max(8, (brows // 8) * 8)   # non-full block rows: multiple of 8
    grid = pl.cdiv(rows, brows)

    itemsize = jnp.dtype(dtype).itemsize
    out = pl.pallas_call(
        _acos_kernel,
        out_shape=jax.ShapeDtypeStruct((rows, LANE), dtype),
        grid=(grid,),
        in_specs=[pl.BlockSpec((brows, LANE), lambda i: (i, 0))],
        out_specs=pl.BlockSpec((brows, LANE), lambda i: (i, 0)),
        compiler_params=pltpu.CompilerParams(
            dimension_semantics=("parallel",),    # megacore sharding on v7x
            vmem_limit_bytes=VMEM_LIMIT_BYTES),
        cost_estimate=pl.CostEstimate(
            flops=24 * rows * LANE,
            transcendentals=rows * LANE,
            bytes_accessed=2 * itemsize * rows * LANE),
    )(x2)

    out_flat = out.reshape(-1)
    if rem != 0:
        # Ragged tail (< 128 elements): plain jnp, no full-array pad/slice pass.
        tail = jnp.arccos(xf[n_main:]).astype(dtype)
        out_flat = jnp.concatenate([out_flat, tail])
    return out_flat.reshape(orig_shape)


# TODO(synk): quantized/QAT path (SegmentLUT int LUT + qat clamp fake-quant) is
# not translated; only the float forward (plain acos) is implemented.


if __name__ == "__main__":
    key = jax.random.PRNGKey(0)

    # Main test: small NCHW input, values in the acos domain [-1, 1].
    x = jax.random.uniform(key, (2, 4, 16, 16), dtype=jnp.float32,
                           minval=-1.0, maxval=1.0)
    y = jax.block_until_ready(acos_pallas(x))
    y_ref = jnp.arccos(x)
    assert y.shape == x.shape and y.dtype == x.dtype
    assert jnp.allclose(y, y_ref, atol=1e-5, rtol=1e-5), float(
        jnp.max(jnp.abs(y - y_ref)))

    # Boundary / branch-split values, tiled so they go through the kernel path.
    vals = jnp.array([-1.0, -0.999999, -0.75, -0.5, -0.499999, -0.25, 0.0,
                      0.25, 0.499999, 0.5, 0.75, 0.999999, 1.0, -0.1, 0.1,
                      0.9], dtype=jnp.float32)
    xb = jnp.tile(vals, 16)                      # 256 elements -> kernel path
    yb = jax.block_until_ready(acos_pallas(xb))
    yb_ref = jnp.arccos(xb)
    assert jnp.allclose(yb, yb_ref, atol=1e-5, rtol=1e-5), float(
        jnp.max(jnp.abs(yb - yb_ref)))

    # Ragged size (exercises kernel prefix + jnp tail path, no full pad copy).
    xr = jax.random.uniform(jax.random.PRNGKey(1), (3, 100), dtype=jnp.float32,
                            minval=-1.0, maxval=1.0)
    yr = jax.block_until_ready(acos_pallas(xr))
    assert jnp.allclose(yr, jnp.arccos(xr), atol=1e-5, rtol=1e-5)

    # bf16 I/O (compute stays in f32 inside the kernel).
    xh = x.astype(jnp.bfloat16)
    yh = jax.block_until_ready(acos_pallas(xh))
    assert yh.dtype == jnp.bfloat16 and yh.shape == xh.shape
    assert jnp.allclose(yh.astype(jnp.float32),
                        jnp.arccos(xh.astype(jnp.float32)), atol=2e-2)

    print("KERNEL_OK")
</pallas_src>

<mosaic_0001>
module attributes {stable_mosaic.version = 11 : i64} {
  func.func @_acos_kernel(%arg0: i32, %arg1: memref<16x128xf32, #tpu.memory_space<vmem>>, %arg2: memref<16x128xf32, #tpu.memory_space<vmem>>) attributes {dimension_semantics = [#tpu.dimension_semantics<parallel>], iteration_bounds = array<i64: 1>, scalar_prefetch = 0 : i64, scratch_operands = 0 : i64, tpu.core_type = #tpu.core_type<tc>, window_params = [{transform_indices = @transform_0, window_bounds = array<i64: 16, 128>}, {transform_indices = @transform_1, window_bounds = array<i64: 16, 128>}]} {
    %c0 = arith.constant 0 : index
    %c0_0 = arith.constant 0 : index
    %0 = vector.load %arg1[%c0, %c0_0] : memref<16x128xf32, #tpu.memory_space<vmem>>, vector<16x128xf32>
    %1 = math.absf %0 : vector<16x128xf32>
    %cst = arith.constant 5.000000e-01 : f32
    %2 = vector.broadcast %cst : f32 to vector<16x128xf32>
    %3 = arith.cmpf olt, %1, %2 : vector<16x128xf32>
    %4 = arith.mulf %0, %0 : vector<16x128xf32>
    %cst_1 = arith.constant 1.000000e+00 : f32
    %5 = vector.broadcast %cst_1 : f32 to vector<16x128xf32>
    %6 = arith.subf %5, %1 : vector<16x128xf32>
    %cst_2 = arith.constant 5.000000e-01 : f32
    %7 = vector.broadcast %cst_2 : f32 to vector<16x128xf32>
    %8 = arith.mulf %6, %7 : vector<16x128xf32>
    %9 = arith.select %3, %4, %8 : vector<16x128xi1>, vector<16x128xf32>
    %cst_3 = arith.constant 0.0368459411 : f32
    %10 = vector.broadcast %cst_3 : f32 to vector<16x128xf32>
    %11 = arith.mulf %10, %9 : vector<16x128xf32>
    %cst_4 = arith.constant 0.0446428582 : f32
    %12 = vector.broadcast %cst_4 : f32 to vector<16x128xf32>
    %13 = arith.addf %11, %12 : vector<16x128xf32>
    %14 = arith.mulf %13, %9 : vector<16x128xf32>
    %cst_5 = arith.constant 7.500000e-02 : f32
    %15 = vector.broadcast %cst_5 : f32 to vector<16x128xf32>
    %16 = arith.addf %14, %15 : vector<16x128xf32>
    %17 = arith.mulf %16, %9 : vector<16x128xf32>
    %cst_6 = arith.constant 0.166666672 : f32
    %18 = vector.broadcast %cst_6 : f32 to vector<16x128xf32>
    %19 = arith.addf %17, %18 : vector<16x128xf32>
    %20 = arith.mulf %19, %9 : vector<16x128xf32>
    %cst_7 = arith.constant 1.000000e+00 : f32
    %21 = vector.broadcast %cst_7 : f32 to vector<16x128xf32>
    %22 = arith.addf %20, %21 : vector<16x128xf32>
    %23 = math.sqrt %9 : vector<16x128xf32>
    %24 = arith.addf %23, %23 : vector<16x128xf32>
    %25 = arith.mulf %24, %22 : vector<16x128xf32>
    %cst_8 = arith.constant 0.000000e+00 : f32
    %26 = vector.broadcast %cst_8 : f32 to vector<16x128xf32>
    %27 = arith.cmpf olt, %0, %26 : vector<16x128xf32>
    %cst_9 = arith.constant 3.14159274 : f32
    %28 = vector.broadcast %cst_9 : f32 to vector<16x128xf32>
    %29 = arith.subf %28, %25 : vector<16x128xf32>
    %30 = arith.select %27, %29, %25 : vector<16x128xi1>, vector<16x128xf32>
    %31 = arith.mulf %0, %22 : vector<16x128xf32>
    %cst_10 = arith.constant 1.57079637 : f32
    %32 = vector.broadcast %cst_10 : f32 to vector<16x128xf32>
    %33 = arith.subf %32, %31 : vector<16x128xf32>
    %34 = arith.select %3, %33, %30 : vector<16x128xi1>, vector<16x128xf32>
    %c0_11 = arith.constant 0 : index
    %c0_12 = arith.constant 0 : index
    %35 = vector.load %arg2[%c0_11, %c0_12] : memref<16x128xf32, #tpu.memory_space<vmem>>, vector<16x128xf32>
    tpu.vector_store %arg2[%c0_11, %c0_12], %34 {strides = array<i32>} : memref<16x128xf32, #tpu.memory_space<vmem>>, vector<16x128xf32>,
    return
  }
  func.func @transform_0(%arg0: i32) -> (i32, i32) {
    %c0_i32 = arith.constant 0 : i32
    %c0_i32_0 = arith.constant 0 : i32
    return %arg0, %c0_i32 : i32, i32
  }
  func.func @transform_1(%arg0: i32) -> (i32, i32) {
    %c0_i32 = arith.constant 0 : i32
    %c0_i32_0 = arith.constant 0 : i32
    return %arg0, %c0_i32 : i32, i32
  }
}

</mosaic_0001>

<bundles_post_ra>
// kernel: tpu_custom_call.1
= control target key start
LH: loop header
LB: loop body
LE: loop exit
PB: predicated region body
PF: predicated region fallthrough
CT: control target
= control target key end

     0   :  { %6 = vsyncpa [#allocation3], 0  ;;  %s203_s0 = inlined_call_operand.hbm [shape: f32[16,128], index: 0, kind: input, shape index: {}]   ;;  %s204_s1 = inlined_call_operand.hbm [shape: f32[16,128], index: 1, kind: output, shape index: {}]  }
   0x1   :  { %7 = vsyncpa [#allocation4], 0  ;;  %s154_s6 = smov [#allocation2]  }
   0x2   :  { %s13_s7 = sshll.u32 %s154_s6, 4  ;;  %s14_s7 = int_to_ptr.vmem [resolvable:$true] %s13_s7 }
   0x3   :  { %s118_s8 = scalar_lea.vmem %s14_s7, 256  ;;  %p123_p1 = scmp.lt.s32.totalorder %s14_s7, %s14_s7 }
   0x4   :  { %p119_p0 = scmp.ne.s32.totalorder %s14_s7, %s118_s8  ;;  %p124_p2 = scmp.lt.s32.totalorder %s118_s8, %s118_s8 }
   0x6   :  { %p125_p3 = por %p124_p2, %p123_p1 }
   0x8   :  { %p126_p4 = pnand %p125_p3, %p119_p0 }
   0xa   :  { %129 = shalt.err (!%p126_p4)
}
   0xb   :  { %s155_s9 = smov 128   ;;  %s156_s10 = smov 8  }
   0xc   :  { %19 = dma.hbm_to_vmem [thread:$0]  %s203_s0, 256, %s14_s7, [#allocation3], %s155_s9, %s155_s9, %s156_s10  }
   0xd   :  { %150 = dma.done.wait [#allocation3], 256  }
   0xe   :  { %151 = vsyncadd [#allocation3], 4294967040  ;;  %v23_v0 = vld [vmem:[#allocation2] sm:$0xff]  ;;  %v174_v1 = vld [vmem:[#allocation2 + $0x8] sm:$0xff]  ;;  %s157_s0 = smov [#allocation5]  }
   0xf   :  { %v25_v2 = vand.u32 2147483647, %v23_v0  ;;  %v26_v3 = vand.u32 2147483647, %v174_v1  ;;  %v29_v4 = vmul.f32 %v23_v0, %v23_v0  ;;  %v30_v6 = vmul.f32 %v174_v1, %v174_v1  ;;  %s90_s13 = sshll.u32 %s157_s0, 4  ;;  %s91_s13 = int_to_ptr.vmem [resolvable:$true] %s90_s13 }
  0x10   :  { %vm71_vm6 = vcmp.lt.f32.partialorder %v23_v0, 0.0  ;;  %vm72_vm7 = vcmp.lt.f32.partialorder %v174_v1, 0.0  ;;  %s130_s14 = scalar_lea.vmem %s91_s13, 256  ;;  %p135_p6 = scmp.lt.s32.totalorder %s91_s13, %s91_s13 }
  0x11   :  { %v31_v5 = vsub.f32 1.0, %v25_v2  ;;  %v32_v7 = vsub.f32 1.0, %v26_v3  ;;  %vm179_vm0 = vcmp.lt.f32.partialorder %v25_v2, 0.5  ;;  %vm183_vm1 = vcmp.lt.f32.partialorder %v26_v3, 0.5  ;;  %p131_p5 = scmp.ne.s32.totalorder %s91_s13, %s130_s14  ;;  %p136_p7 = scmp.lt.s32.totalorder %s130_s14, %s130_s14 }
  0x13   :  { %v33_v10 = vmul.f32 0.5, %v31_v5  ;;  %v34_v11 = vmul.f32 0.5, %v32_v7  ;;  %p137_p8 = por %p136_p7, %p135_p6 }
  0x15   :  { %v35_v12 = vsel %vm179_vm0, %v29_v4, %v33_v10  ;;  %v36_v13 = vsel %vm183_vm1, %v30_v6, %v34_v11  ;;  %p138_p9 = pnand %p137_p8, %p131_p5 }
  0x16   :  { %v37_v14 = vmul.f32 0.03684594, %v35_v12  ;;  %106 = vrsqrt.f32 %v35_v12  ;;  %v38_v15 = vmul.f32 0.03684594, %v36_v13  ;;  %vm55_vm2 = vcmp.eq.f32.partialorder %v35_v12, inf }
  0x17   :  { %108 = vrsqrt.f32 %v36_v13  ;;  %vm57_vm3 = vcmp.eq.f32.partialorder %v35_v12, 0.0  ;;  %v58_v28 = vand.u32 2147483648, %v35_v12  ;;  %vm62_vm4 = vcmp.eq.f32.partialorder %v36_v13, inf }
  0x18   :  { %v39_v16 = vadd.f32 0.04464286, %v37_v14  ;;  %v40_v17 = vadd.f32 0.04464286, %v38_v15  ;;  %v65_v33 = vand.u32 2147483648, %v36_v13  ;;  %vm64_vm5 = vcmp.eq.f32.partialorder %v36_v13, 0.0 }
  0x1a   :  { %v41_v18 = vmul.f32 %v39_v16, %v35_v12  ;;  %v42_v19 = vmul.f32 %v40_v17, %v36_v13 }
  0x1c   :  { %v43_v20 = vadd.f32 0.075, %v41_v18  ;;  %v44_v21 = vadd.f32 0.075, %v42_v19 }
  0x1e   :  { %v45_v22 = vmul.f32 %v43_v20, %v35_v12  ;;  %v46_v23 = vmul.f32 %v44_v21, %v36_v13 }
  0x20   :  { %v47_v24 = vadd.f32 0.16666667, %v45_v22  ;;  %v48_v25 = vadd.f32 0.16666667, %v46_v23 }
  0x22   :  { %v49_v26 = vmul.f32 %v47_v24, %v35_v12  ;;  %v50_v29 = vmul.f32 %v48_v25, %v36_v13 }
  0x23   :  { %v107_v27 = vpop.eup %106 }
  0x24   :  { %v109_v30 = vpop.eup %108  ;;  %v51_v31 = vadd.f32 1.0, %v49_v26  ;;  %v54_v32 = vmul.f32 %v107_v27, %v35_v12  ;;  %v52_v34 = vadd.f32 1.0, %v50_v29 }
  0x25   :  { %v61_v35 = vmul.f32 %v109_v30, %v36_v13 }
  0x26   :  { %v56_v36 = vsel %vm55_vm2, %v35_v12, %v54_v32  ;;  %v77_v38 = vmul.f32 %v51_v31, %v23_v0  ;;  %v78_v42 = vmul.f32 %v52_v34, %v174_v1 }
  0x27   :  { %v59_v37 = vsel %vm57_vm3, %v58_v28, %v56_v36  ;;  %v63_v39 = vsel %vm62_vm4, %v36_v13, %v61_v35 }
  0x28   :  { %v67_v40 = vadd.f32 %v59_v37, %v59_v37  ;;  %v66_v41 = vsel %vm64_vm5, %v65_v33, %v63_v39  ;;  %v79_v45 = vsub.f32 1.5707964, %v77_v38  ;;  %v80_v48 = vsub.f32 1.5707964, %v78_v42 }
  0x29   :  { %v68_v43 = vadd.f32 %v66_v41, %v66_v41 }
  0x2a   :  { %v69_v44 = vmul.f32 %v67_v40, %v51_v31 }
  0x2b   :  { %v70_v46 = vmul.f32 %v68_v43, %v52_v34 }
  0x2c   :  { %v73_v47 = vsub.f32 3.1415927, %v69_v44 }
  0x2d   :  { %v74_v49 = vsub.f32 3.1415927, %v70_v46 }
  0x2e   :  { %v75_v50 = vsel %vm71_vm6, %v73_v47, %v69_v44 }
  0x2f   :  { %v81_v51 = vsel %vm179_vm0, %v79_v45, %v75_v50  ;;  %v76_v52 = vsel %vm72_vm7, %v74_v49, %v70_v46 }
  0x30   :  { %83 = vst [vmem:[#allocation5] sm:$0xff] %v81_v51  ;;  %v82_v53 = vsel %vm183_vm1, %v80_v48, %v76_v52 }
  0x31   :  { %84 = vst [vmem:[#allocation5 + $0x8] sm:$0xff] %v82_v53 }
  0x32   :  { %141 = shalt.err (!%p138_p9)
}
  0x33   :  { %96 = dma.vmem_to_hbm [thread:$0]  %s91_s13, 256, %s204_s1, [#allocation4], %s155_s9, %s155_s9, %s156_s10  }
  0x34   :  { %152 = dma.done.wait [#allocation4], 256  }
  0x35   :  { %153 = vsyncadd [#allocation4], 4294967040 }
  0x36   :  { %100 = vsyncpa [#allocation3], 1 }
  0x37   :  { %101 = vsyncpa [#allocation4], 1 }

</bundles_post_ra>
